<compile_context>
chip_gen: v7x
topology: tpu7x:2x2x1
jax: 0.10.0
libtpu: 0.0.40
codegen_flags: <defaults>
</compile_context>

<pallas_src>
import functools

import jax
import jax.numpy as jnp
from jax.experimental import pallas as pl
from jax.experimental.pallas import tpu as pltpu

_NEG_LOGIT = -1e9  # sigmoid(_NEG_LOGIT) == 0.0 exactly


def _dice_partial_kernel(x_ref, t_ref, o_ref, *, block_rows, lane, rows_total,
                         steps_per_split):
    """Accumulate vector partials of (sigmoid(x)*t, sigmoid(x)+t).

    Grid: (n_split [parallel], steps [arbitrary reduction]).
    o_ref block is (1, 2, 8, lane), resident across the reduction axis.
    """
    c = pl.program_id(0)
    step = pl.program_id(1)

    @pl.when(step == 0)
    def _init():
        o_ref[...] = jnp.zeros_like(o_ref)

    # Logical block index along the row axis (may overhang rows_total when the
    # grid is rounded up / split unevenly -- those rows are masked below).
    g = c * steps_per_split + step
    valid = rows_total - g * block_rows   # number of real-data rows in this tile

    x = x_ref[...].astype(jnp.float32)
    t = t_ref[...].astype(jnp.float32)

    r8 = block_rows // 8

    def _accumulate(s, tv):
        # Group rows by 8 and reduce only the leading axis: pure VPU vreg adds.
        s3 = s.reshape(r8, 8, lane)
        t3 = tv.reshape(r8, 8, lane)
        o_ref[0, 0] += jnp.sum(s3 * t3, axis=0)   # intersection partials
        o_ref[0, 1] += jnp.sum(s3 + t3, axis=0)   # sum(s) + sum(t) partials

    @pl.when(valid >= block_rows)          # common case: full tile, no masking
    def _full():
        _accumulate(jax.nn.sigmoid(x), t)

    @pl.when(valid < block_rows)           # boundary / overhang tile: mask rows
    def _partial():
        rid = jax.lax.broadcasted_iota(jnp.int32, (block_rows, lane), 0)
        keep = rid < valid                 # valid <= 0 -> everything masked
        xm = jnp.where(keep, x, _NEG_LOGIT)   # sigmoid(-1e9) == 0
        tm = jnp.where(keep, t, 0.0)
        _accumulate(jax.nn.sigmoid(xm), tm)


def _tensorcores_per_chip():
    """2 on chips with two schedulable TensorCores (v7x, and v4/v5p megacore)."""
    try:
        kind = jax.devices()[0].device_kind.lower()
    except Exception:
        return 1
    if "v7" in kind or "v4" in kind or "v5p" in kind:
        return 2
    return 1


def dice_loss(inputs, targets, smooth=1.0, target_block_bytes=4 * 1024 * 1024):
    """Pallas implementation of DiceLoss.forward.

    inputs:  [B, C, H, W] logits (f32/bf16/fp16; NCHW like the PyTorch module)
    targets: same number of elements as `inputs` (e.g. [B*C*H, W]); any numeric
             dtype (int8/bool binary masks are cheapest on HBM bandwidth).
    target_block_bytes: combined (x + t) bytes per grid block.
    """
    N = inputs.size
    if targets.size != N:
        # NOTE: general PyTorch-style broadcasting of smaller targets is not
        # supported; targets must match the flattened inputs elementwise.
        raise ValueError(
            f"targets.size ({targets.size}) must equal inputs.size ({N})")

    x = inputs.reshape(-1)
    t = targets.reshape(-1)

    # --- pick a lane width that makes the flat->2D reshape a free view -------
    lane = None
    for cand in (512, 256, 128):
        if N % cand == 0 and (N // cand) >= 8:
            lane = cand
            break
    if lane is None:
        # Rare fallback (tiny N, or N not a multiple of 128): pad with
        # reduction-neutral values.  This is the only path that copies, and it
        # only triggers for inputs where the copy is negligible or unavoidable.
        # TODO(synk): replace with a manual-DMA tail handler for huge odd N.
        lane = 128
        rows_padded = pl.cdiv(N, 8 * lane) * 8
        pad = rows_padded * lane - N
        x = jnp.pad(x, (0, pad), constant_values=_NEG_LOGIT)
        t = jnp.pad(t, (0, pad))
    rows_total = x.size // lane

    x2 = x.reshape(rows_total, lane)   # free view of contiguous data
    t2 = t.reshape(rows_total, lane)

    # --- block sizing from combined x+t bytes per row ------------------------
    bytes_per_row = lane * (x2.dtype.itemsize + t2.dtype.itemsize)
    block_rows = max(32, (target_block_bytes // bytes_per_row) // 32 * 32)
    if block_rows > rows_total:
        # Never let the block exceed the array; keep sublane-friendly multiples.
        if rows_total >= 32:
            block_rows = (rows_total // 32) * 32
        else:
            block_rows = (rows_total // 8) * 8   # rows_total >= 8 guaranteed
    n_blocks = pl.cdiv(rows_total, block_rows)

    # --- grid: split across TensorCores only where a second core exists ------
    n_split = 2 if (_tensorcores_per_chip() == 2 and n_blocks >= 2) else 1
    steps_per_split = pl.cdiv(n_blocks, n_split)

    if n_split * steps_per_split == n_blocks:
        row_index_map = lambda c, i: (c * steps_per_split + i, 0)
    else:
        # Odd block count split over 2 cores: clamp the single overhanging step
        # to a valid block; the kernel masks its contribution to exactly zero.
        row_index_map = lambda c, i: (
            jnp.minimum(c * steps_per_split + i, n_blocks - 1), 0)

    # --- VMEM budget derived from the actual footprint -----------------------
    in_block_bytes = block_rows * bytes_per_row            # one x block + one t block
    f32_block_bytes = block_rows * lane * 4                # one full-block f32 temp
    out_block_bytes = 2 * 8 * lane * 4
    vmem_limit = (2 * in_block_bytes            # double-buffered inputs
                  + 2 * out_block_bytes         # resident accumulator
                  + 8 * f32_block_bytes         # casts / sigmoid / products temps
                  + (2 << 20))                  # margin
    vmem_limit = int(min(max(vmem_limit, 16 << 20), 48 << 20))  # v7x: 64 MiB/TC

    kernel = functools.partial(
        _dice_partial_kernel, block_rows=block_rows, lane=lane,
        rows_total=rows_total, steps_per_split=steps_per_split)

    partials = pl.pallas_call(
        kernel,
        out_shape=jax.ShapeDtypeStruct((n_split, 2, 8, lane), jnp.float32),
        grid_spec=pltpu.PrefetchScalarGridSpec(
            num_scalar_prefetch=0,
            grid=(n_split, steps_per_split),
            in_specs=[
                pl.BlockSpec((block_rows, lane), row_index_map),
                pl.BlockSpec((block_rows, lane), row_index_map),
            ],
            out_specs=pl.BlockSpec((1, 2, 8, lane),
                                   lambda c, i: (c, 0, 0, 0)),
        ),
        compiler_params=pltpu.CompilerParams(
            dimension_semantics=("parallel", "arbitrary"),
            vmem_limit_bytes=vmem_limit,
        ),
    )(x2, t2)

    # Tiny epilogue: one cross-lane reduce over the (n_split, 2, 8, lane)
    # partials + the O(1) dice formula (fused into the same jit).
    sums = jnp.sum(partials, axis=(0, 2, 3))            # (2,)
    intersection, denom = sums[0], sums[1]
    smooth = jnp.float32(smooth)
    dice = (2.0 * intersection + smooth) / (denom + smooth)
    return 1.0 - dice


def _dice_loss_ref(inputs, targets, smooth=1.0):
    """Plain-JAX reference mirroring the PyTorch forward."""
    B, C, H, W = inputs.shape
    x = jax.nn.sigmoid(inputs.astype(jnp.float32)).reshape(B * C * H, W)
    t = targets.astype(jnp.float32)
    intersection = jnp.sum(x * t)
    dice = (2.0 * intersection + smooth) / (jnp.sum(x) + jnp.sum(t) + smooth)
    return 1.0 - dice


if __name__ == "__main__":
    key = jax.random.PRNGKey(0)
    k_in, k_tg = jax.random.split(key)

    B, C, H, W = 2, 4, 16, 16
    inputs = jax.random.normal(k_in, (B, C, H, W), dtype=jnp.float32)
    # binary segmentation masks shaped like the flattened inputs [B*C*H, W];
    # int8 targets shrink HBM traffic vs f32 and cast exactly inside the kernel.
    targets = (jax.random.uniform(k_tg, (B * C * H, W)) > 0.5).astype(jnp.int8)

    loss_fn = jax.jit(dice_loss)
    loss = loss_fn(inputs, targets)
    loss = jax.block_until_ready(loss)

    ref = _dice_loss_ref(inputs, targets, smooth=1.0)
    assert jnp.allclose(loss, ref, atol=1e-5, rtol=1e-5), (loss, ref)

    print("KERNEL_OK")
</pallas_src>

<mosaic_0001>
module attributes {stable_mosaic.version = 11 : i64} {
  func.func @_dice_partial_kernel(%arg0: i32, %arg1: i32, %arg2: memref<8x256xf32, #tpu.memory_space<vmem>>, %arg3: memref<8x256xi8, #tpu.memory_space<vmem>>, %arg4: memref<1x2x8x256xf32, #tpu.memory_space<vmem>>) attributes {dimension_semantics = [#tpu.dimension_semantics<parallel>, #tpu.dimension_semantics<arbitrary>], iteration_bounds = array<i64: 1, 1>, scalar_prefetch = 0 : i64, scratch_operands = 0 : i64, tpu.core_type = #tpu.core_type<tc>, window_params = [{transform_indices = @transform_0, window_bounds = array<i64: 8, 256>}, {transform_indices = @transform_1, window_bounds = array<i64: 8, 256>}, {transform_indices = @transform_2, window_bounds = array<i64: 1, 2, 8, 256>}]} {
    %c0_i32 = arith.constant 0 : i32
    %0 = arith.cmpi eq, %arg1, %c0_i32 : i32
    %1 = arith.extui %0 : i1 to i32
    %c0_i32_0 = arith.constant 0 : i32
    %2 = arith.cmpi ne, %1, %c0_i32_0 : i32
    scf.if %2 {
      %cst = arith.constant 0.000000e+00 : f32
      %16 = vector.broadcast %cst : f32 to vector<1x2x8x256xf32>
      %c0_9 = arith.constant 0 : index
      %c0_10 = arith.constant 0 : index
      %c0_11 = arith.constant 0 : index
      %c0_12 = arith.constant 0 : index
      %17 = vector.load %arg4[%c0_9, %c0_10, %c0_11, %c0_12] : memref<1x2x8x256xf32, #tpu.memory_space<vmem>>, vector<1x2x8x256xf32>
      tpu.vector_store %arg4[%c0_9, %c0_10, %c0_11, %c0_12], %16 {strides = array<i32>} : memref<1x2x8x256xf32, #tpu.memory_space<vmem>>, vector<1x2x8x256xf32>,
    } else {
    }
    %c1_i32 = arith.constant 1 : i32
    %3 = arith.muli %arg0, %c1_i32 : i32
    %4 = arith.addi %3, %arg1 : i32
    %c8_i32 = arith.constant 8 : i32
    %5 = arith.muli %4, %c8_i32 : i32
    %c8_i32_1 = arith.constant 8 : i32
    %6 = arith.subi %c8_i32_1, %5 : i32
    %c0 = arith.constant 0 : index
    %c0_2 = arith.constant 0 : index
    %7 = vector.load %arg2[%c0, %c0_2] : memref<8x256xf32, #tpu.memory_space<vmem>>, vector<8x256xf32>
    %c0_3 = arith.constant 0 : index
    %c0_4 = arith.constant 0 : index
    %8 = vector.load %arg3[%c0_3, %c0_4] : memref<8x256xi8, #tpu.memory_space<vmem>>, vector<8x256xi8>
    %9 = arith.sitofp %8 : vector<8x256xi8> to vector<8x256xf32>
    %c8_i32_5 = arith.constant 8 : i32
    %10 = arith.cmpi sge, %6, %c8_i32_5 : i32
    %11 = arith.extui %10 : i1 to i32
    %c0_i32_6 = arith.constant 0 : i32
    %12 = arith.cmpi ne, %11, %c0_i32_6 : i32
    scf.if %12 {
      %16 = arith.negf %7 : vector<8x256xf32>
      %17 = math.exp %16 : vector<8x256xf32>
      %cst = arith.constant 1.000000e+00 : f32
      %18 = vector.broadcast %cst : f32 to vector<8x256xf32>
      %19 = arith.addf %18, %17 : vector<8x256xf32>
      %20 = arith.divf %18, %19 : vector<8x256xf32>
      %21 = vector.shape_cast %20 : vector<8x256xf32> to vector<1x8x256xf32>
      %22 = vector.shape_cast %9 : vector<8x256xf32> to vector<1x8x256xf32>
      %c0_9 = arith.constant 0 : index
      %c0_10 = arith.constant 0 : index
      %c0_11 = arith.constant 0 : index
      %c0_12 = arith.constant 0 : index
      %23 = vector.load %arg4[%c0_9, %c0_10, %c0_11, %c0_12] : memref<1x2x8x256xf32, #tpu.memory_space<vmem>>, vector<1x1x8x256xf32>
      %24 = vector.shape_cast %23 : vector<1x1x8x256xf32> to vector<8x256xf32>
      %25 = arith.mulf %21, %22 : vector<1x8x256xf32>
      %cst_13 = arith.constant dense<0.000000e+00> : vector<8x256xf32>
      %26 = vector.multi_reduction <add>, %25, %cst_13 [0] : vector<1x8x256xf32> to vector<8x256xf32>
      %27 = arith.addf %24, %26 : vector<8x256xf32>
      %c0_14 = arith.constant 0 : index
      %c0_15 = arith.constant 0 : index
      %c0_16 = arith.constant 0 : index
      %c0_17 = arith.constant 0 : index
      %28 = vector.load %arg4[%c0_14, %c0_15, %c0_16, %c0_17] : memref<1x2x8x256xf32, #tpu.memory_space<vmem>>, vector<1x1x8x256xf32>
      %29 = vector.shape_cast %28 : vector<1x1x8x256xf32> to vector<8x256xf32>
      %30 = vector.shape_cast %27 : vector<8x256xf32> to vector<1x1x8x256xf32>
      tpu.vector_store %arg4[%c0_14, %c0_15, %c0_16, %c0_17], %30 {strides = array<i32>} : memref<1x2x8x256xf32, #tpu.memory_space<vmem>>, vector<1x1x8x256xf32>,
      %c0_18 = arith.constant 0 : index
      %c1 = arith.constant 1 : index
      %c0_19 = arith.constant 0 : index
      %c0_20 = arith.constant 0 : index
      %31 = vector.load %arg4[%c0_18, %c1, %c0_19, %c0_20] : memref<1x2x8x256xf32, #tpu.memory_space<vmem>>, vector<1x1x8x256xf32>
      %32 = vector.shape_cast %31 : vector<1x1x8x256xf32> to vector<8x256xf32>
      %33 = arith.addf %21, %22 : vector<1x8x256xf32>
      %cst_21 = arith.constant dense<0.000000e+00> : vector<8x256xf32>
      %34 = vector.multi_reduction <add>, %33, %cst_21 [0] : vector<1x8x256xf32> to vector<8x256xf32>
      %35 = arith.addf %32, %34 : vector<8x256xf32>
      %c0_22 = arith.constant 0 : index
      %c1_23 = arith.constant 1 : index
      %c0_24 = arith.constant 0 : index
      %c0_25 = arith.constant 0 : index
      %36 = vector.load %arg4[%c0_22, %c1_23, %c0_24, %c0_25] : memref<1x2x8x256xf32, #tpu.memory_space<vmem>>, vector<1x1x8x256xf32>
      %37 = vector.shape_cast %36 : vector<1x1x8x256xf32> to vector<8x256xf32>
      %38 = vector.shape_cast %35 : vector<8x256xf32> to vector<1x1x8x256xf32>
      tpu.vector_store %arg4[%c0_22, %c1_23, %c0_24, %c0_25], %38 {strides = array<i32>} : memref<1x2x8x256xf32, #tpu.memory_space<vmem>>, vector<1x1x8x256xf32>,
    } else {
    }
    %c8_i32_7 = arith.constant 8 : i32
    %13 = arith.cmpi slt, %6, %c8_i32_7 : i32
    %14 = arith.extui %13 : i1 to i32
    %c0_i32_8 = arith.constant 0 : i32
    %15 = arith.cmpi ne, %14, %c0_i32_8 : i32
    scf.if %15 {
      %16 = tpu.iota {dimensions = array<i32: 0>} : vector<8x256xi32>
      %17 = vector.broadcast %6 : i32 to vector<8x256xi32>
      %18 = arith.cmpi slt, %16, %17 : vector<8x256xi32>
      %cst = arith.constant -1.000000e+09 : f32
      %19 = vector.broadcast %cst : f32 to vector<8x256xf32>
      %20 = arith.select %18, %7, %19 : vector<8x256xi1>, vector<8x256xf32>
      %cst_9 = arith.constant 0.000000e+00 : f32
      %21 = vector.broadcast %cst_9 : f32 to vector<8x256xf32>
      %22 = arith.select %18, %9, %21 : vector<8x256xi1>, vector<8x256xf32>
      %23 = arith.negf %20 : vector<8x256xf32>
      %24 = math.exp %23 : vector<8x256xf32>
      %cst_10 = arith.constant 1.000000e+00 : f32
      %25 = vector.broadcast %cst_10 : f32 to vector<8x256xf32>
      %26 = arith.addf %25, %24 : vector<8x256xf32>
      %27 = arith.divf %25, %26 : vector<8x256xf32>
      %28 = vector.shape_cast %27 : vector<8x256xf32> to vector<1x8x256xf32>
      %29 = vector.shape_cast %22 : vector<8x256xf32> to vector<1x8x256xf32>
      %c0_11 = arith.constant 0 : index
      %c0_12 = arith.constant 0 : index
      %c0_13 = arith.constant 0 : index
      %c0_14 = arith.constant 0 : index
      %30 = vector.load %arg4[%c0_11, %c0_12, %c0_13, %c0_14] : memref<1x2x8x256xf32, #tpu.memory_space<vmem>>, vector<1x1x8x256xf32>
      %31 = vector.shape_cast %30 : vector<1x1x8x256xf32> to vector<8x256xf32>
      %32 = arith.mulf %28, %29 : vector<1x8x256xf32>
      %cst_15 = arith.constant dense<0.000000e+00> : vector<8x256xf32>
      %33 = vector.multi_reduction <add>, %32, %cst_15 [0] : vector<1x8x256xf32> to vector<8x256xf32>
      %34 = arith.addf %31, %33 : vector<8x256xf32>
      %c0_16 = arith.constant 0 : index
      %c0_17 = arith.constant 0 : index
      %c0_18 = arith.constant 0 : index
      %c0_19 = arith.constant 0 : index
      %35 = vector.load %arg4[%c0_16, %c0_17, %c0_18, %c0_19] : memref<1x2x8x256xf32, #tpu.memory_space<vmem>>, vector<1x1x8x256xf32>
      %36 = vector.shape_cast %35 : vector<1x1x8x256xf32> to vector<8x256xf32>
      %37 = vector.shape_cast %34 : vector<8x256xf32> to vector<1x1x8x256xf32>
      tpu.vector_store %arg4[%c0_16, %c0_17, %c0_18, %c0_19], %37 {strides = array<i32>} : memref<1x2x8x256xf32, #tpu.memory_space<vmem>>, vector<1x1x8x256xf32>,
      %c0_20 = arith.constant 0 : index
      %c1 = arith.constant 1 : index
      %c0_21 = arith.constant 0 : index
      %c0_22 = arith.constant 0 : index
      %38 = vector.load %arg4[%c0_20, %c1, %c0_21, %c0_22] : memref<1x2x8x256xf32, #tpu.memory_space<vmem>>, vector<1x1x8x256xf32>
      %39 = vector.shape_cast %38 : vector<1x1x8x256xf32> to vector<8x256xf32>
      %40 = arith.addf %28, %29 : vector<1x8x256xf32>
      %cst_23 = arith.constant dense<0.000000e+00> : vector<8x256xf32>
      %41 = vector.multi_reduction <add>, %40, %cst_23 [0] : vector<1x8x256xf32> to vector<8x256xf32>
      %42 = arith.addf %39, %41 : vector<8x256xf32>
      %c0_24 = arith.constant 0 : index
      %c1_25 = arith.constant 1 : index
      %c0_26 = arith.constant 0 : index
      %c0_27 = arith.constant 0 : index
      %43 = vector.load %arg4[%c0_24, %c1_25, %c0_26, %c0_27] : memref<1x2x8x256xf32, #tpu.memory_space<vmem>>, vector<1x1x8x256xf32>
      %44 = vector.shape_cast %43 : vector<1x1x8x256xf32> to vector<8x256xf32>
      %45 = vector.shape_cast %42 : vector<8x256xf32> to vector<1x1x8x256xf32>
      tpu.vector_store %arg4[%c0_24, %c1_25, %c0_26, %c0_27], %45 {strides = array<i32>} : memref<1x2x8x256xf32, #tpu.memory_space<vmem>>, vector<1x1x8x256xf32>,
    } else {
    }
    return
  }
  func.func @transform_0(%arg0: i32, %arg1: i32) -> (i32, i32) {
    %c1_i32 = arith.constant 1 : i32
    %0 = arith.muli %arg0, %c1_i32 : i32
    %1 = arith.addi %0, %arg1 : i32
    %c0_i32 = arith.constant 0 : i32
    %c0_i32_0 = arith.constant 0 : i32
    return %1, %c0_i32 : i32, i32
  }
  func.func @transform_1(%arg0: i32, %arg1: i32) -> (i32, i32) {
    %c1_i32 = arith.constant 1 : i32
    %0 = arith.muli %arg0, %c1_i32 : i32
    %1 = arith.addi %0, %arg1 : i32
    %c0_i32 = arith.constant 0 : i32
    %c0_i32_0 = arith.constant 0 : i32
    return %1, %c0_i32 : i32, i32
  }
  func.func @transform_2(%arg0: i32, %arg1: i32) -> (i32, i32, i32, i32) {
    %c0_i32 = arith.constant 0 : i32
    %c0_i32_0 = arith.constant 0 : i32
    %c0_i32_1 = arith.constant 0 : i32
    %c0_i32_2 = arith.constant 0 : i32
    return %arg0, %c0_i32, %c0_i32_0, %c0_i32_1 : i32, i32, i32, i32
  }
}

</mosaic_0001>

<bundles_post_ra>
// kernel: dice_loss.1
= control target key start
LH: loop header
LB: loop body
LE: loop exit
PB: predicated region body
PF: predicated region fallthrough
CT: control target
= control target key end

     0   :  { %s224_s0 = inlined_call_operand.vmem [shape: f32[8,256], index: 0, kind: input, shape index: {}]   ;;  %s225_s1 = inlined_call_operand.vmem [shape: s8[8,256], index: 1, kind: input, shape index: {}]   ;;  %s226_s2 = inlined_call_operand.vmem [shape: f32[1,2,8,256], index: 2, kind: output, shape index: {}]  }
   0x1   :  { %v62_v0 = vld [vmem:[%s224_s0] sm:$0xff]  ;;  %v63_v1 = vld [vmem:[%s224_s0 + $0x8] sm:$0xff] }
   0x2   :  { %v167_v2 = vmul.f32 -1.442695, %v62_v0  ;;  %v168_v3 = vmul.f32 -1.442695, %v63_v1  ;;  %v64_v8 = vld [vmem:[%s225_s1] sm:$0xf] }
   0x3   :  { %v65_v9 = vunpack.c.0.s8 %v64_v8  ;;  %v66_v10 = vunpack.c.1.s8 %v64_v8 }
   0x4   :  { %180 = vpow2.f32 %v167_v2 }
   0x5   :  { %182 = vpow2.f32 %v168_v3  ;;  %v67_v11 = vcvt.s32.f32 %v65_v9  ;;  %v68_v12 = vcvt.s32.f32 %v66_v10 }
   0xe   :  { %v181_v4 = vpop.eup %180 }
   0xf   :  { %v183_v5 = vpop.eup %182  ;;  %v79_v6 = vadd.f32 1.0, %v181_v4 }
  0x10   :  { %v80_v7 = vadd.f32 1.0, %v183_v5 }
  0x11   :  { %184 = vrcp.f32 %v79_v6 }
  0x12   :  { %186 = vrcp.f32 %v80_v7 }
  0x1b   :  { %v185_v13 = vpop.eup %184 }
  0x1c   :  { %v187_v14 = vpop.eup %186  ;;  %v87_v15 = vmul.f32 %v185_v13, %v67_v11  ;;  %v98_v16 = vadd.f32 %v185_v13, %v67_v11 }
  0x1d   :  { %v88_v17 = vmul.f32 %v187_v14, %v68_v12  ;;  %v99_v18 = vadd.f32 %v187_v14, %v68_v12 }
  0x1e   :  { %93 = vst [vmem:[%s226_s2] sm:$0xff] %v87_v15  ;;  %171 = vst [vmem:[%s226_s2 + $0x10] sm:$0xff] %v98_v16 }
  0x1f   :  { %94 = vst [vmem:[%s226_s2 + $0x8] sm:$0xff] %v88_v17  ;;  %172 = vst [vmem:[%s226_s2 + $0x18] sm:$0xff] %v99_v18 }

</bundles_post_ra>
